<compile_context>
chip_gen: v7x
topology: tpu7x:2x2x1
jax: 0.10.0
libtpu: 0.0.40
codegen_flags: <defaults>
</compile_context>

<pallas_src>
import functools

import jax
import jax.numpy as jnp
from jax.experimental import pallas as pl
from jax.experimental.pallas import tpu as pltpu


_LN_EPS = 1e-5
_NEG_INF = -1e30


def _vmem_limit_bytes():
    """Generation-aware scoped-VMEM limit (~3/4 of physical, capped)."""
    try:
        info = pltpu.get_tpu_info()
        cap = int(getattr(info, "vmem_capacity_bytes", 0) or 0)
        if cap > 0:
            return int(min(cap * 3 // 4, 100 * 1024 * 1024))
    except Exception:
        pass
    return 48 * 1024 * 1024   # conservative fallback (safe even on v7x)


_VMEM_LIMIT = None


def _cparams(*sem):
    global _VMEM_LIMIT
    if _VMEM_LIMIT is None:
        _VMEM_LIMIT = _vmem_limit_bytes()
    return pltpu.CompilerParams(dimension_semantics=sem,
                                vmem_limit_bytes=_VMEM_LIMIT)


def _tile(dim, target, align):
    """Largest tile <= target that divides `dim` and is a multiple of `align`.
    Falls back to the full dim (single block) when no aligned divisor exists
    or when the dim already fits."""
    if dim <= target:
        return dim
    t = (target // align) * align
    while t >= align:
        if dim % t == 0:
            return t
        t -= align
    return dim


def _pad_to(n, mult):
    return ((n + mult - 1) // mult) * mult


# ----------------------------- Pallas kernels ------------------------------ #

def _layernorm(x, g, b):
    mu = jnp.mean(x, axis=-1, keepdims=True)
    xc = x - mu
    var = jnp.mean(xc * xc, axis=-1, keepdims=True)
    return xc * jax.lax.rsqrt(var + _LN_EPS) * g + b


def _gelu(h):
    # TODO(synk): PyTorch nn.GELU() defaults to the exact erf form; tanh
    # approximation used here (max abs diff ~1e-3) since erf may not lower.
    return 0.5 * h * (1.0 + jnp.tanh(0.7978845608028654 *
                                     (h + 0.044715 * h * h * h)))


def _proj_ln_kernel(*refs, has_bias, has_res):
    # refs: x, ln_g, ln_b, w, [bias], [residual], out, ln_scratch
    # Grid is (M tiles, N tiles); LN(x) computed once per M tile (j == 0) into
    # VMEM scratch (in the weight dtype) and reused for every N tile.
    x_ref, g_ref, b_ref, w_ref = refs[:4]
    idx = 4
    bias_ref = refs[idx] if has_bias else None
    idx += int(has_bias)
    res_ref = refs[idx] if has_res else None
    idx += int(has_res)
    o_ref, ln_ref = refs[idx], refs[idx + 1]

    @pl.when(pl.program_id(1) == 0)
    def _():
        x = x_ref[...].astype(jnp.float32)
        ln = _layernorm(x, g_ref[...].astype(jnp.float32),
                        b_ref[...].astype(jnp.float32))
        ln_ref[...] = ln.astype(ln_ref.dtype)

    acc = jnp.dot(ln_ref[...], w_ref[...], preferred_element_type=jnp.float32)
    if has_bias:
        acc = acc + bias_ref[...].astype(jnp.float32)
    if has_res:
        acc = acc + res_ref[...].astype(jnp.float32)
    o_ref[...] = acc.astype(o_ref.dtype)


def _proj_wmajor_kernel(*refs, has_ln, has_bias, has_res):
    # refs: x, [ln_g, ln_b], w, [bias], [residual], out
    # Grid is (N tiles, M tiles); weight block constant across the inner M loop
    # so it is fetched from HBM once per N tile.
    idx = 0
    x_ref = refs[idx]; idx += 1
    if has_ln:
        g_ref, b_ref = refs[idx], refs[idx + 1]
        idx += 2
    w_ref = refs[idx]; idx += 1
    bias_ref = refs[idx] if has_bias else None
    idx += int(has_bias)
    res_ref = refs[idx] if has_res else None
    idx += int(has_res)
    o_ref = refs[idx]

    if has_ln:
        x = _layernorm(x_ref[...].astype(jnp.float32),
                       g_ref[...].astype(jnp.float32),
                       b_ref[...].astype(jnp.float32)).astype(w_ref.dtype)
    else:
        x = x_ref[...]
        if x.dtype != w_ref.dtype:   # skip f32 round-trip when dtypes match
            x = x.astype(w_ref.dtype)
    acc = jnp.dot(x, w_ref[...], preferred_element_type=jnp.float32)
    if has_bias:
        acc = acc + bias_ref[...].astype(jnp.float32)
    if has_res:
        acc = acc + res_ref[...].astype(jnp.float32)
    o_ref[...] = acc.astype(o_ref.dtype)


def _mlp_kernel(x_ref, g_ref, b_ref, w1_ref, b1_ref, w2_ref, b2_ref,
                o_ref, ln_ref, acc_ref):
    # out = x + (GELU(LN(x) @ W1 + b1) @ W2 + b2); hidden (4C) tiled on axis 1.
    # LN(x) cached in VMEM scratch at j==0; f32 accumulator across H tiles.
    j = pl.program_id(1)

    @pl.when(j == 0)
    def _():
        x = x_ref[...].astype(jnp.float32)
        ln = _layernorm(x, g_ref[...].astype(jnp.float32),
                        b_ref[...].astype(jnp.float32))
        ln_ref[...] = ln.astype(ln_ref.dtype)
        acc_ref[...] = jnp.zeros_like(acc_ref)

    h = jnp.dot(ln_ref[...], w1_ref[...], preferred_element_type=jnp.float32)
    h = _gelu(h + b1_ref[...].astype(jnp.float32))
    acc_ref[...] += jnp.dot(h.astype(w2_ref.dtype), w2_ref[...],
                            preferred_element_type=jnp.float32)

    @pl.when(j == pl.num_programs(1) - 1)
    def _():
        out = (x_ref[...].astype(jnp.float32) + acc_ref[...]
               + b2_ref[...].astype(jnp.float32))
        o_ref[...] = out.astype(o_ref.dtype)


def _attention_kernel(q_ref, k_ref, v_ref, o_ref, acc_ref, *, n_head, scale,
                      causal):
    # q_ref: (1, Tqt, C), k_ref/v_ref: (1, Tk, C) lane-block views of the fused
    # projections; acc_ref: (Tqt, C) f32 scratch for a lane-dense final store.
    Tq, Tk = q_ref.shape[1], k_ref.shape[1]
    C = o_ref.shape[2]
    Dh = C // n_head

    if causal:
        q0 = pl.program_id(1) * Tq
        row = jax.lax.broadcasted_iota(jnp.int32, (Tq, Tk), 0) + q0
        col = jax.lax.broadcasted_iota(jnp.int32, (Tq, Tk), 1)
        neg = jnp.where(col > row, _NEG_INF, 0.0).astype(jnp.float32)

    # TODO(synk): for very long Tk (cross-attn at 1500 frames) switch to an
    # online-softmax (flash) form tiled over Tk to bound VMEM further and
    # overlap K/V DMAs; bf16 K/V already halves the resident footprint.
    for h in range(n_head):
        lo = h * Dh
        q = q_ref[0, :, lo:lo + Dh]                                # (Tq, Dh) bf16
        k = k_ref[0, :, lo:lo + Dh]                                # (Tk, Dh) bf16
        v = v_ref[0, :, lo:lo + Dh]                                # (Tk, Dh) bf16
        # QK^T without materializing a transpose: contract the last dims.
        s = jax.lax.dot_general(q, k, (((1,), (1,)), ((), ())),
                                preferred_element_type=jnp.float32) * scale
        if causal:
            s = s + neg
        s = s - jnp.max(s, axis=-1, keepdims=True)
        p = jnp.exp(s)
        p = p * pl.reciprocal(jnp.sum(p, axis=-1, keepdims=True), approx=True)
        # Per-head result goes straight to the f32 scratch (bounded liveness).
        acc_ref[:, lo:lo + Dh] = jnp.dot(p.astype(v.dtype), v,
                                         preferred_element_type=jnp.float32)
    # Single lane-dense (Tqt, C) store per grid step (no per-head 64-lane vst).
    o_ref[0, :, :] = acc_ref[...].astype(o_ref.dtype)


# ------------------------------ kernel wrappers ----------------------------- #

def proj(x, w, *, ln=None, bias=None, residual=None, out_dtype=None,
         weight_major=None, m_tile=512, n_tile=1024):
    """out = [residual +] (LN(x) if ln else x) @ w [+ bias], tiled over (M, N).

    weight_major=True  -> grid (N tiles, M tiles): weight block reused across M.
    weight_major=False -> grid (M tiles, N tiles): LN(x) cached in VMEM scratch.
    """
    M, K = x.shape
    N = w.shape[1]
    out_dtype = out_dtype or x.dtype
    if weight_major is None:
        weight_major = ln is None
    Mt = _tile(M, m_tile, 16)       # 16-sublane alignment for bf16
    Nt = _tile(N, n_tile, 128)
    has_bias = bias is not None
    has_res = residual is not None

    if weight_major:
        grid = (N // Nt, M // Mt)
        x_map = lambda n, m: (m, 0)
        p_map = lambda n, m: (0, 0)
        w_map = lambda n, m: (0, n)
        b_map = lambda n, m: (0, n)
        r_map = lambda n, m: (m, n)
        o_map = lambda n, m: (m, n)
        sem = ("parallel", "parallel")
        scratch = []
        kern = functools.partial(_proj_wmajor_kernel, has_ln=ln is not None,
                                 has_bias=has_bias, has_res=has_res)
    else:
        assert ln is not None
        grid = (M // Mt, N // Nt)
        x_map = lambda i, j: (i, 0)
        p_map = lambda i, j: (0, 0)
        w_map = lambda i, j: (0, j)
        b_map = lambda i, j: (0, j)
        r_map = lambda i, j: (i, j)
        o_map = lambda i, j: (i, j)
        sem = ("parallel", "arbitrary")   # keep j sequential for the LN cache
        scratch = [pltpu.VMEM((Mt, K), w.dtype)]
        kern = functools.partial(_proj_ln_kernel, has_bias=has_bias,
                                 has_res=has_res)

    in_specs = [pl.BlockSpec((Mt, K), x_map)]
    args = [x]
    if ln is not None:
        g, b = ln
        in_specs += [pl.BlockSpec((1, K), p_map), pl.BlockSpec((1, K), p_map)]
        args += [g.reshape(1, K), b.reshape(1, K)]
    in_specs.append(pl.BlockSpec((K, Nt), w_map))
    args.append(w)
    if has_bias:
        in_specs.append(pl.BlockSpec((1, Nt), b_map))
        args.append(bias.reshape(1, N))
    if has_res:
        in_specs.append(pl.BlockSpec((Mt, Nt), r_map))
        args.append(residual)

    return pl.pallas_call(
        kern,
        out_shape=jax.ShapeDtypeStruct((M, N), out_dtype),
        grid=grid,
        in_specs=in_specs,
        out_specs=pl.BlockSpec((Mt, Nt), o_map),
        scratch_shapes=scratch,
        compiler_params=_cparams(*sem),
    )(*args)


def mlp_block(x2, ln_g, ln_b, w1, b1, w2, b2, *, m_tile=512, h_tile=1024):
    """x + MLP(LN(x)) with the 4C hidden dimension tiled and accumulated."""
    M, C = x2.shape
    H = w1.shape[1]
    Mt = _tile(M, m_tile, 16)
    Ht = _tile(H, h_tile, 128)
    return pl.pallas_call(
        _mlp_kernel,
        out_shape=jax.ShapeDtypeStruct((M, C), x2.dtype),
        grid=(M // Mt, H // Ht),
        in_specs=[
            pl.BlockSpec((Mt, C), lambda i, j: (i, 0)),
            pl.BlockSpec((1, C), lambda i, j: (0, 0)),
            pl.BlockSpec((1, C), lambda i, j: (0, 0)),
            pl.BlockSpec((C, Ht), lambda i, j: (0, j)),
            pl.BlockSpec((1, Ht), lambda i, j: (0, j)),
            pl.BlockSpec((Ht, C), lambda i, j: (j, 0)),
            pl.BlockSpec((1, C), lambda i, j: (0, 0)),
        ],
        out_specs=pl.BlockSpec((Mt, C), lambda i, j: (i, 0)),
        scratch_shapes=[pltpu.VMEM((Mt, C), w1.dtype),       # cached LN(x)
                        pltpu.VMEM((Mt, C), jnp.float32)],   # f32 accumulator
        compiler_params=_cparams("parallel", "arbitrary"),
    )(x2, ln_g.reshape(1, C), ln_b.reshape(1, C), w1, b1.reshape(1, H), w2,
      b2.reshape(1, C))


def attention(q_arr, kv_arr, *, n_state, n_head, q_block, k_block, v_block,
              causal, q_tile=256):
    """q_arr / kv_arr hold q/k/v as lane-blocks of width n_state (the BlockSpecs
    view directly into the fused projections — no slicing copies in JAX)."""
    B, Tq, _ = q_arr.shape
    Tk = kv_arr.shape[1]
    C = n_state
    scale = float(C // n_head) ** -0.5   # == Dh^-.25 applied to both q and k
    Tqt = _tile(Tq, q_tile, 16)

    kern = functools.partial(_attention_kernel, n_head=n_head, scale=scale,
                             causal=causal)
    return pl.pallas_call(
        kern,
        out_shape=jax.ShapeDtypeStruct((B, Tq, C), q_arr.dtype),
        grid=(B, Tq // Tqt),
        in_specs=[
            pl.BlockSpec((1, Tqt, C), lambda b, qi: (b, qi, q_block)),
            pl.BlockSpec((1, Tk, C), lambda b, qi: (b, 0, k_block)),
            pl.BlockSpec((1, Tk, C), lambda b, qi: (b, 0, v_block)),
        ],
        out_specs=pl.BlockSpec((1, Tqt, C), lambda b, qi: (b, qi, 0)),
        scratch_shapes=[pltpu.VMEM((Tqt, C), jnp.float32)],
        compiler_params=_cparams("parallel", "parallel"),
    )(q_arr, kv_arr, kv_arr)


# --------------------------- module-level forward --------------------------- #

def residual_block(x, xa, p, n_head):
    B, T, C = x.shape
    Tk = xa.shape[1]
    x2 = x.reshape(B * T, C)

    # --- self attention: fused LN + QKV projection, residual fused into out ---
    qkv = proj(x2, p["attn"]["w_qkv"], ln=(p["attn_ln_g"], p["attn_ln_b"]),
               bias=p["attn"]["b_qkv"]).reshape(B, T, 3 * C)
    wv = attention(qkv, qkv, n_state=C, n_head=n_head,
                   q_block=0, k_block=1, v_block=2, causal=True)
    x2 = proj(wv.reshape(B * T, C), p["attn"]["wo"], bias=p["attn"]["bo"],
              residual=x2)

    # --- cross attention (no mask; K/V projected from xa with fused weight) ---
    # TODO(synk): kv_cache hooks (cross-attn K/V reuse across decode steps) are
    # not implemented; this matches the reference's kv_cache=None path.
    q = proj(x2, p["xattn"]["wq"], ln=(p["xattn_ln_g"], p["xattn_ln_b"]),
             bias=p["xattn"]["bq"]).reshape(B, T, C)
    kv = proj(xa.reshape(B * Tk, C), p["xattn"]["w_kv"],
              bias=p["xattn"]["b_kv"]).reshape(B, Tk, 2 * C)
    wv = attention(q, kv, n_state=C, n_head=n_head,
                   q_block=0, k_block=0, v_block=1, causal=False)
    x2 = proj(wv.reshape(B * T, C), p["xattn"]["wo"], bias=p["xattn"]["bo"],
              residual=x2)

    # --- MLP: fused LN -> Linear -> GELU -> Linear -> +residual ---
    x2 = mlp_block(x2, p["mlp_ln_g"], p["mlp_ln_b"],
                   p["mlp"]["w1"], p["mlp"]["b1"],
                   p["mlp"]["w2"], p["mlp"]["b2"])
    return x2.reshape(B, T, C)


def text_decoder_forward(tokens, xa, params):
    B, T = tokens.shape
    emb = params["token_embedding"]          # (V, C) bf16, for the gather
    pos = params["positional_embedding"]     # (n_ctx, C)
    n_head = params["n_head"]
    V, C = emb.shape

    # offset = 0 (no kv_cache). Embedding gather stays in plain JAX.
    x = jnp.take(emb, tokens, axis=0) + pos[:T]
    x = x.astype(xa.dtype)

    for p in params["blocks"]:
        x = residual_block(x, xa, p, n_head)

    # Final LayerNorm fused into the tied-embedding logits projection; the
    # embedding is pre-transposed and vocab-padded to a 128-lane multiple at
    # init (weight_major grid -> each vocab tile streamed from HBM once).
    logits = proj(x.reshape(B * T, C), params["token_embedding_t"],
                  ln=(params["ln_g"], params["ln_b"]),
                  out_dtype=jnp.float32, weight_major=True)
    return logits[:, :V].reshape(B, T, V)


# ------------------------------ parameter init ------------------------------ #

def init_params(key, n_vocab, n_ctx, n_state, n_head, n_layer):
    keys = iter(jax.random.split(key, 8 + n_layer * 16))
    wdt = jnp.bfloat16   # matmul weights & activations; LN params/biases f32

    def nrm(shape, scale=0.02, dtype=jnp.float32):
        return (scale * jax.random.normal(next(keys), shape)).astype(dtype)

    def self_attn_params():
        wq = nrm((n_state, n_state)); wk = nrm((n_state, n_state))
        wv = nrm((n_state, n_state))
        bq, bv = nrm((n_state,)), nrm((n_state,))
        return {
            "w_qkv": jnp.concatenate([wq, wk, wv], axis=1).astype(wdt),  # (C,3C)
            "b_qkv": jnp.concatenate([bq, jnp.zeros_like(bq), bv]),      # no k bias
            "wo": nrm((n_state, n_state), dtype=wdt), "bo": nrm((n_state,)),
        }

    def cross_attn_params():
        wk = nrm((n_state, n_state)); wv = nrm((n_state, n_state))
        bv = nrm((n_state,))
        return {
            "wq": nrm((n_state, n_state), dtype=wdt), "bq": nrm((n_state,)),
            "w_kv": jnp.concatenate([wk, wv], axis=1).astype(wdt),       # (C,2C)
            "b_kv": jnp.concatenate([jnp.zeros_like(bv), bv]),           # no k bias
            "wo": nrm((n_state, n_state), dtype=wdt), "bo": nrm((n_state,)),
        }

    blocks = []
    for _ in range(n_layer):
        blocks.append({
            "attn_ln_g": jnp.ones((n_state,), jnp.float32),
            "attn_ln_b": jnp.zeros((n_state,), jnp.float32),
            "attn": self_attn_params(),
            "xattn_ln_g": jnp.ones((n_state,), jnp.float32),
            "xattn_ln_b": jnp.zeros((n_state,), jnp.float32),
            "xattn": cross_attn_params(),
            "mlp_ln_g": jnp.ones((n_state,), jnp.float32),
            "mlp_ln_b": jnp.zeros((n_state,), jnp.float32),
            "mlp": {
                "w1": nrm((n_state, 4 * n_state), dtype=wdt), "b1": nrm((4 * n_state,)),
                "w2": nrm((4 * n_state, n_state), dtype=wdt), "b2": nrm((n_state,)),
            },
        })

    emb = nrm((n_vocab, n_state))                       # f32 master copy
    v_pad = _pad_to(n_vocab, 128)                       # lane-align vocab
    emb_t = jnp.zeros((n_state, v_pad), jnp.float32).at[:, :n_vocab].set(emb.T)

    return {
        "token_embedding": emb.astype(wdt),             # (V, C) for the gather
        "token_embedding_t": emb_t.astype(wdt),         # (C, Vpad) for logits
        "positional_embedding": nrm((n_ctx, n_state), dtype=wdt),
        "blocks": blocks,
        "ln_g": jnp.ones((n_state,), jnp.float32),
        "ln_b": jnp.zeros((n_state,), jnp.float32),
        "n_head": n_head,
    }


# ----------------------------------- main ----------------------------------- #

if __name__ == "__main__":
    # Small, lane-aligned ModelDimensions-consistent sizes.
    n_vocab, n_text_ctx, n_text_state, n_text_head, n_text_layer = 512, 64, 128, 4, 2
    n_audio_ctx = 32
    B, T = 2, 16

    key = jax.random.PRNGKey(0)
    k_tok, k_xa, k_par = jax.random.split(key, 3)

    tokens = jax.random.randint(k_tok, (B, T), 0, n_vocab, dtype=jnp.int32)
    xa = jax.random.normal(k_xa, (B, n_audio_ctx, n_text_state)).astype(jnp.bfloat16)
    params = init_params(k_par, n_vocab, n_text_ctx, n_text_state,
                         n_text_head, n_text_layer)

    logits = text_decoder_forward(tokens, xa, params)
    jax.block_until_ready(logits)

    assert logits.shape == (B, T, n_vocab) and logits.dtype == jnp.float32
    assert bool(jnp.all(jnp.isfinite(logits)))
    print("KERNEL_OK")
</pallas_src>

<mosaic_0001>
module attributes {stable_mosaic.version = 11 : i64} {
  func.func @_proj_ln_kernel(%arg0: i32, %arg1: i32, %arg2: memref<32x128xbf16, #tpu.memory_space<vmem>>, %arg3: memref<1x128xf32, #tpu.memory_space<vmem>>, %arg4: memref<1x128xf32, #tpu.memory_space<vmem>>, %arg5: memref<128x384xbf16, #tpu.memory_space<vmem>>, %arg6: memref<1x384xf32, #tpu.memory_space<vmem>>, %arg7: memref<32x384xbf16, #tpu.memory_space<vmem>>, %arg8: memref<32x128xbf16, #tpu.memory_space<vmem>>) attributes {dimension_semantics = [#tpu.dimension_semantics<parallel>, #tpu.dimension_semantics<arbitrary>], iteration_bounds = array<i64: 1, 1>, scalar_prefetch = 0 : i64, scratch_operands = 1 : i64, tpu.core_type = #tpu.core_type<tc>, window_params = [{transform_indices = @transform_0, window_bounds = array<i64: 32, 128>}, {pipeline_mode = #tpu.pipeline_mode<synchronous>, transform_indices = @transform_1, window_bounds = array<i64: 1, 128>}, {pipeline_mode = #tpu.pipeline_mode<synchronous>, transform_indices = @transform_2, window_bounds = array<i64: 1, 128>}, {transform_indices = @transform_3, window_bounds = array<i64: 128, 384>}, {transform_indices = @transform_4, window_bounds = array<i64: 1, 384>}, {transform_indices = @transform_5, window_bounds = array<i64: 32, 384>}]} {
    %c0_i32 = arith.constant 0 : i32
    %0 = arith.cmpi eq, %arg1, %c0_i32 : i32
    %1 = arith.extui %0 : i1 to i32
    %c0_i32_0 = arith.constant 0 : i32
    %2 = arith.cmpi ne, %1, %c0_i32_0 : i32
    scf.if %2 {
      %c0_8 = arith.constant 0 : index
      %c0_9 = arith.constant 0 : index
      %11 = vector.load %arg2[%c0_8, %c0_9] : memref<32x128xbf16, #tpu.memory_space<vmem>>, vector<32x128xbf16>
      %12 = arith.extf %11 : vector<32x128xbf16> to vector<32x128xf32>
      %c0_10 = arith.constant 0 : index
      %c0_11 = arith.constant 0 : index
      %13 = vector.load %arg3[%c0_10, %c0_11] : memref<1x128xf32, #tpu.memory_space<vmem>>, vector<1x128xf32>
      %c0_12 = arith.constant 0 : index
      %c0_13 = arith.constant 0 : index
      %14 = vector.load %arg4[%c0_12, %c0_13] : memref<1x128xf32, #tpu.memory_space<vmem>>, vector<1x128xf32>
      %cst_14 = arith.constant dense<0.000000e+00> : vector<32xf32>
      %15 = vector.multi_reduction <add>, %12, %cst_14 [1] : vector<32x128xf32> to vector<32xf32>
      %16 = vector.shape_cast %15 : vector<32xf32> to vector<32x1xf32>
      %cst_15 = arith.constant 1.280000e+02 : f32
      %17 = vector.broadcast %cst_15 : f32 to vector<32x1xf32>
      %18 = arith.divf %16, %17 : vector<32x1xf32>
      %19 = vector.broadcast %18 : vector<32x1xf32> to vector<32x128xf32>
      %20 = arith.subf %12, %19 : vector<32x128xf32>
      %21 = arith.mulf %20, %20 : vector<32x128xf32>
      %cst_16 = arith.constant dense<0.000000e+00> : vector<32xf32>
      %22 = vector.multi_reduction <add>, %21, %cst_16 [1] : vector<32x128xf32> to vector<32xf32>
      %23 = vector.shape_cast %22 : vector<32xf32> to vector<32x1xf32>
      %cst_17 = arith.constant 1.280000e+02 : f32
      %24 = vector.broadcast %cst_17 : f32 to vector<32x1xf32>
      %25 = arith.divf %23, %24 : vector<32x1xf32>
      %cst_18 = arith.constant 9.99999974E-6 : f32
      %26 = vector.broadcast %cst_18 : f32 to vector<32x1xf32>
      %27 = arith.addf %25, %26 : vector<32x1xf32>
      %28 = math.rsqrt %27 : vector<32x1xf32>
      %29 = vector.broadcast %28 : vector<32x1xf32> to vector<32x128xf32>
      %30 = arith.mulf %20, %29 : vector<32x128xf32>
      %31 = vector.broadcast %13 : vector<1x128xf32> to vector<32x128xf32>
      %32 = arith.mulf %30, %31 : vector<32x128xf32>
      %33 = vector.broadcast %14 : vector<1x128xf32> to vector<32x128xf32>
      %34 = arith.addf %32, %33 : vector<32x128xf32>
      %35 = arith.truncf %34 : vector<32x128xf32> to vector<32x128xbf16>
      %c0_19 = arith.constant 0 : index
      %c0_20 = arith.constant 0 : index
      %36 = vector.load %arg8[%c0_19, %c0_20] : memref<32x128xbf16, #tpu.memory_space<vmem>>, vector<32x128xbf16>
      tpu.vector_store %arg8[%c0_19, %c0_20], %35 {strides = array<i32>} : memref<32x128xbf16, #tpu.memory_space<vmem>>, vector<32x128xbf16>,
    } else {
    }
    %c0 = arith.constant 0 : index
    %c0_1 = arith.constant 0 : index
    %3 = vector.load %arg8[%c0, %c0_1] : memref<32x128xbf16, #tpu.memory_space<vmem>>, vector<32x128xbf16>
    %c0_2 = arith.constant 0 : index
    %c0_3 = arith.constant 0 : index
    %4 = vector.load %arg5[%c0_2, %c0_3] : memref<128x384xbf16, #tpu.memory_space<vmem>>, vector<128x384xbf16>
    %cst = arith.constant dense<0.000000e+00> : vector<32x384xf32>
    %5 = tpu.matmul %3, %4, %cst {dimension_numbers = #tpu.dot_dimension_numbers<[1], [0], [0], [1], [0, 0, 1, 1], [], []>} : vector<32x128xbf16>, vector<128x384xbf16>, vector<32x384xf32> -> vector<32x384xf32>
    %c0_4 = arith.constant 0 : index
    %c0_5 = arith.constant 0 : index
    %6 = vector.load %arg6[%c0_4, %c0_5] : memref<1x384xf32, #tpu.memory_space<vmem>>, vector<1x384xf32>
    %7 = vector.broadcast %6 : vector<1x384xf32> to vector<32x384xf32>
    %8 = arith.addf %5, %7 : vector<32x384xf32>
    %9 = arith.truncf %8 : vector<32x384xf32> to vector<32x384xbf16>
    %c0_6 = arith.constant 0 : index
    %c0_7 = arith.constant 0 : index
    %10 = vector.load %arg7[%c0_6, %c0_7] : memref<32x384xbf16, #tpu.memory_space<vmem>>, vector<32x384xbf16>
    tpu.vector_store %arg7[%c0_6, %c0_7], %9 {strides = array<i32>} : memref<32x384xbf16, #tpu.memory_space<vmem>>, vector<32x384xbf16>,
    return
  }
  func.func @transform_0(%arg0: i32, %arg1: i32) -> (i32, i32) {
    %c0_i32 = arith.constant 0 : i32
    %c0_i32_0 = arith.constant 0 : i32
    return %arg0, %c0_i32 : i32, i32
  }
  func.func @transform_1(%arg0: i32, %arg1: i32) -> (i32, i32) {
    %c0_i32 = arith.constant 0 : i32
    %c0_i32_0 = arith.constant 0 : i32
    %c0_i32_1 = arith.constant 0 : i32
    return %c0_i32, %c0_i32_0 : i32, i32
  }
  func.func @transform_2(%arg0: i32, %arg1: i32) -> (i32, i32) {
    %c0_i32 = arith.constant 0 : i32
    %c0_i32_0 = arith.constant 0 : i32
    %c0_i32_1 = arith.constant 0 : i32
    return %c0_i32, %c0_i32_0 : i32, i32
  }
  func.func @transform_3(%arg0: i32, %arg1: i32) -> (i32, i32) {
    %c0_i32 = arith.constant 0 : i32
    %c0_i32_0 = arith.constant 0 : i32
    return %c0_i32, %arg1 : i32, i32
  }
  func.func @transform_4(%arg0: i32, %arg1: i32) -> (i32, i32) {
    %c0_i32 = arith.constant 0 : i32
    %c0_i32_0 = arith.constant 0 : i32
    return %c0_i32, %arg1 : i32, i32
  }
  func.func @transform_5(%arg0: i32, %arg1: i32) -> (i32, i32) {
    %c0_i32 = arith.constant 0 : i32
    return %arg0, %arg1 : i32, i32
  }
}

</mosaic_0001>

<bundles_post_ra>
// kernel: tpu_custom_call.1
= control target key start
LH: loop header
LB: loop body
LE: loop exit
PB: predicated region body
PF: predicated region fallthrough
CT: control target
= control target key end

     0   :  { %10 = vsyncpa [#allocation4], 0  ;;  %s790_s0 = inlined_call_operand.hbm [shape: bf16[32,128], index: 0, kind: input, shape index: {}]   ;;  %s791_s1 = inlined_call_operand.vmem [shape: f32[1,128], index: 1, kind: input, shape index: {}]   ;;  %s792_s2 = inlined_call_operand.vmem [shape: f32[1,128], index: 2, kind: input, shape index: {}]   ;;  %s793_s3 = inlined_call_operand.hbm [shape: bf16[128,384], index: 3, kind: input, shape index: {}]   ;;  %s794_s4 = inlined_call_operand.vmem [shape: f32[1,384], index: 4, kind: input, shape index: {}]   ;;  %s795_s5 = inlined_call_operand.hbm [shape: bf16[32,384], index: 5, kind: output, shape index: {}]  }
   0x1   :  { %11 = vsyncpa [#allocation7], 0 }
   0x2   :  { %12 = vsyncpa [#allocation5], 0  ;;  %s681_s18 = smov [#allocation3]   ;;  %s609_s22 = scalar_lea.hbm %s790_s0, 256 }
   0x3   :  { %s18_s19 = sshll.u32 %s681_s18, 4  ;;  %p610_p0 = scmp.ne.s32.totalorder %s790_s0, %s609_s22  ;;  %s19_s19 = int_to_ptr.vmem [resolvable:$true] %s18_s19 }
   0x4   :  { %p613_p1 = scmp.lt.u32.totalorder %s609_s22, %s790_s0 }
   0x6   :  { %p615_p2 = pnand %p613_p1, %p610_p0 }
   0x8   :  { %618 = shalt.err (!%p615_p2)
}
   0x9   :  { %s619_s27 = scalar_lea.vmem %s19_s19, 256  ;;  %p624_p4 = scmp.lt.s32.totalorder %s19_s19, %s19_s19 }
   0xa   :  { %p620_p3 = scmp.ne.s32.totalorder %s19_s19, %s619_s27  ;;  %p625_p5 = scmp.lt.s32.totalorder %s619_s27, %s619_s27 }
   0xc   :  { %p626_p6 = por %p625_p5, %p624_p4 }
   0xe   :  { %p627_p7 = pnand %p626_p6, %p620_p3 }
  0x10   :  { %630 = shalt.err (!%p627_p7)
}
  0x11   :  { %s682_s28 = smov 64   ;;  %s683_s29 = smov 4  }
  0x12   :  { %24 = dma.hbm_to_vmem [thread:$0]  %s790_s0, 256, %s19_s19, [#allocation4], %s682_s28, %s682_s28, %s683_s29  }
  0x13   :  { %s684_s7 = smov [#allocation6]   ;;  %s631_s11 = scalar_lea.hbm %s793_s3, 3072 }
  0x14   :  { %s34_s8 = sshll.u32 %s684_s7, 4  ;;  %p632_p8 = scmp.ne.s32.totalorder %s793_s3, %s631_s11  ;;  %s35_s8 = int_to_ptr.vmem [resolvable:$true] %s34_s8 }
  0x15   :  { %p635_p9 = scmp.lt.u32.totalorder %s631_s11, %s793_s3 }
  0x17   :  { %p637_p10 = pnand %p635_p9, %p632_p8 }
  0x19   :  { %640 = shalt.err (!%p637_p10)
}
  0x1a   :  { %s641_s16 = scalar_lea.vmem %s35_s8, 3072  ;;  %p646_p12 = scmp.lt.s32.totalorder %s35_s8, %s35_s8 }
  0x1b   :  { %p642_p11 = scmp.ne.s32.totalorder %s35_s8, %s641_s16  ;;  %p647_p13 = scmp.lt.s32.totalorder %s641_s16, %s641_s16 }
  0x1d   :  { %p648_p0 = por %p647_p13, %p646_p12 }
  0x1f   :  { %p649_p1 = pnand %p648_p0, %p642_p11 }
  0x21   :  { %652 = shalt.err (!%p649_p1)
}
  0x22   :  { %s685_s0 = smov 192   ;;  %s686_s17 = smov 12  }
  0x23   :  { %40 = dma.hbm_to_vmem [thread:$0]  %s793_s3, 3072, %s35_s8, [#allocation7], %s685_s0, %s685_s0, %s686_s17  }
  0x24   :  { %675 = dma.done.wait [#allocation4], 256  }
  0x25   :  { %676 = vsyncadd [#allocation4], 4294967040 }
  0x26   :  { %677 = dma.done.wait [#allocation7], 3072  }
  0x27   :  { %678 = vsyncadd [#allocation7], 4294964224  ;;  %v523_v0 = vld [vmem:[#allocation3] sm:$0xff]   ;;  %v530_v1 = vld [vmem:[#allocation3 + $0x8] sm:$0xff]   ;;  %v687_v41 = vmov 0  }
  0x28   :  { %v524_v2 = vunpack.c.l.bf16 %v523_v0  ;;  %v528_v3 = vunpack.c.l.bf16 %v530_v1  ;;  %v525_v4 = vunpack.c.h.bf16 %v523_v0  ;;  %v529_v5 = vunpack.c.h.bf16 %v530_v1  ;;  %v569_v6 = vld [vmem:[#allocation6 + $0x4] ss:$12 sps:$4 sm:$0xff]   ;;  %v571_v7 = vld [vmem:[#allocation6] ss:$12 sps:$4 sm:$0xff]   ;;  %v572_v8 = vld [vmem:[#allocation6 + $0x1c] ss:$12 sps:$4 sm:$0xff]   ;;  %344 = vmatprep.mubr.bf16.mxu0 %v687_v41 }
  0x29   :  { %v574_v9 = vld [vmem:[#allocation6 + $0x8] ss:$12 sps:$4 sm:$0xff]   ;;  %312 = vmatprep.subr.bf16.mxu0 %v569_v6  ;;  %v575_v26 = vld [vmem:[#allocation6 + $0x18] ss:$12 sps:$4 sm:$0xff]   ;;  %v578_v28 = vld [vmem:[#allocation6 + $0x20] ss:$12 sps:$4 sm:$0xff]  }
  0x2a   :  { %64 = vadd.xlane.f32.xlu0 %v524_v2  ;;  %68 = vadd.xlane.f32.xlu1 %v528_v3  ;;  %v576_v27 = vld [vmem:[#allocation6 + $0x34] ss:$12 sps:$4 sm:$0xff]   ;;  %v579_v29 = vld [vmem:[#allocation6 + $0x30] ss:$12 sps:$4 sm:$0xff]   ;;  %v580_v30 = vld [vmem:[#allocation6 + $0x4c] ss:$12 sps:$4 sm:$0xff]  }
  0x2b   :  { %313 = vmatpush1.bf16.msra.mxu0 %v571_v7  ;;  %541 = vmatprep.subr.bf16.mxu1 %v574_v9  ;;  %v582_v31 = vld [vmem:[#allocation6 + $0x38] ss:$12 sps:$4 sm:$0xff]   ;;  %v583_v32 = vld [vmem:[#allocation6 + $0x48] ss:$12 sps:$4 sm:$0xff]   ;;  %v586_v34 = vld [vmem:[#allocation6 + $0x50] ss:$12 sps:$4 sm:$0xff]  }
  0x2c   :  { %314 = vmatprep.subr.bf16.mxu0 %v572_v8  ;;  %542 = vmatpush3.bf16.msra.mxu1 %v574_v9  ;;  %v584_v33 = vld [vmem:[#allocation6 + $0x64] ss:$12 sps:$4 sm:$0xff]   ;;  %v587_v35 = vld [vmem:[#allocation6 + $0x60] ss:$12 sps:$4 sm:$0xff]   ;;  %v588_v36 = vld [vmem:[#allocation6 + $0x7c] ss:$12 sps:$4 sm:$0xff]  }
  0x2d   :  { %543 = vmatprep.subr.bf16.mxu1 %v578_v28  ;;  %v590_v37 = vld [vmem:[#allocation6 + $0x68] ss:$12 sps:$4 sm:$0xff]   ;;  %v591_v38 = vld [vmem:[#allocation6 + $0x78] ss:$12 sps:$4 sm:$0xff]   ;;  %v594_v40 = vld [vmem:[#allocation6 + $0x80] ss:$12 sps:$4 sm:$0xff]  }
  0x2e   :  { %66 = vadd.xlane.f32.xlu0 %v525_v4  ;;  %70 = vadd.xlane.f32.xlu1 %v529_v5  ;;  %v592_v39 = vld [vmem:[#allocation6 + $0x94] ss:$12 sps:$4 sm:$0xff]   ;;  %v595_v42 = vld [vmem:[#allocation6 + $0x90] ss:$12 sps:$4 sm:$0xff]   ;;  %v596_v43 = vld [vmem:[#allocation6 + $0xac] ss:$12 sps:$4 sm:$0xff]  }
  0x2f   :  { %315 = vmatpush1.bf16.msra.mxu0 %v575_v26  ;;  %v598_v44 = vld [vmem:[#allocation6 + $0x98] ss:$12 sps:$4 sm:$0xff]   ;;  %v599_v45 = vld [vmem:[#allocation6 + $0xa8] ss:$12 sps:$4 sm:$0xff]   ;;  %v600_v46 = vld [vmem:[#allocation6 + $0xb0] ss:$12 sps:$4 sm:$0xff]  }
  0x30   :  { %316 = vmatprep.subr.bf16.mxu0 %v576_v27  ;;  %544 = vmatpush3.bf16.msra.mxu1 %v578_v28  ;;  %v480_v61 = vld [vmem:[%s791_s1] ss:$0 sm:$0xff] }
  0x31   :  { %545 = vmatprep.subr.bf16.mxu1 %v582_v31 }
  0x33   :  { %317 = vmatpush1.bf16.msra.mxu0 %v579_v29 }
  0x34   :  { %318 = vmatprep.subr.bf16.mxu0 %v580_v30  ;;  %546 = vmatpush3.bf16.msra.mxu1 %v582_v31 }
  0x35   :  { %547 = vmatprep.subr.bf16.mxu1 %v586_v34 }
  0x37   :  { %319 = vmatpush1.bf16.msra.mxu0 %v583_v32 }
  0x38   :  { %320 = vmatprep.subr.bf16.mxu0 %v584_v33  ;;  %548 = vmatpush3.bf16.msra.mxu1 %v586_v34 }
  0x39   :  { %549 = vmatprep.subr.bf16.mxu1 %v590_v37 }
  0x3b   :  { %321 = vmatpush1.bf16.msra.mxu0 %v587_v35 }
  0x3c   :  { %322 = vmatprep.subr.bf16.mxu0 %v588_v36  ;;  %550 = vmatpush3.bf16.msra.mxu1 %v590_v37 }
  0x3d   :  { %551 = vmatprep.subr.bf16.mxu1 %v594_v40 }
  0x3f   :  { %323 = vmatpush1.bf16.msra.mxu0 %v591_v38 }
  0x40   :  { %324 = vmatprep.subr.bf16.mxu0 %v592_v39  ;;  %552 = vmatpush3.bf16.msra.mxu1 %v594_v40 }
  0x41   :  { %553 = vmatprep.subr.bf16.mxu1 %v598_v44 }
  0x43   :  { %325 = vmatpush1.bf16.msra.mxu0 %v595_v42 }
  0x44   :  { %326 = vmatprep.subr.bf16.mxu0 %v596_v43  ;;  %554 = vmatpush3.bf16.msra.mxu1 %v598_v44 }
  0x45   :  { %555 = vmatprep.subr.bf16.mxu1 %v600_v46 }
  0x47   :  { %327 = vmatpush1.bf16.msra.mxu0 %v599_v45 }
  0x48   :  { %556 = vmatpush3.bf16.msra.mxu1 %v600_v46 }
  0xb7   :  { %v65_v10 = vpop.xlane.xlu0 %64  ;;  %v69_v11 = vpop.xlane.xlu1 %68 }
  0xb8   :  { %v73_v12 = vmul.f32 0.0078125, %v65_v10  ;;  %v75_v13 = vmul.f32 0.0078125, %v69_v11 }
  0xba   :  { %v746_v14 = vsub.f32 %v524_v2, %v73_v12  ;;  %v748_v15 = vsub.f32 %v528_v3, %v75_v13  ;;  %v481_v2 = vld [vmem:[%s792_s2] ss:$0 sm:$0xff] }
  0xbb   :  { %v67_v16 = vpop.xlane.xlu0 %66  ;;  %v71_v17 = vpop.xlane.xlu1 %70 }
  0xbc   :  { %v74_v18 = vmul.f32 0.0078125, %v67_v16  ;;  %v81_v19 = vmul.f32 %v746_v14, %v746_v14  ;;  %v76_v20 = vmul.f32 0.0078125, %v71_v17  ;;  %v83_v23 = vmul.f32 %v748_v15, %v748_v15 }
  0xbd   :  { %v169_v16 = vlaneseq }
  0xbe   :  { %v752_v21 = vsub.f32 %v525_v4, %v74_v18  ;;  %85 = vadd.xlane.f32.xlu0 %v81_v19  ;;  %v754_v22 = vsub.f32 %v529_v5, %v76_v20  ;;  %v167_v18 = vld [vmem:[%s794_s4] sm:$0x7]  ;;  %s688_s4 = smov [#allocation8]  }
  0xbf   :  { %v170_v17 = vshrl.u32 %v169_v16, 7  ;;  %s467_s23 = sshll.u32 %s688_s4, 4  ;;  %s468_s23 = int_to_ptr.vmem [resolvable:$true] %s467_s23 }
  0xc0   :  { %v82_v24 = vmul.f32 %v752_v21, %v752_v21  ;;  %v84_v25 = vmul.f32 %v754_v22, %v754_v22  ;;  %s653_s24 = scalar_lea.vmem %s468_s23, 768  ;;  %p658_p3 = scmp.lt.s32.totalorder %s468_s23, %s468_s23 }
  0xc1   :  { %v175_v19 = vsub.s32 1, %v170_v17  ;;  %p654_p2 = scmp.ne.s32.totalorder %s468_s23, %s653_s24  ;;  %p659_p4 = scmp.lt.s32.totalorder %s653_s24, %s653_s24 }
  0xc2   :  { %89 = vadd.xlane.f32.xlu0 %v83_v23  ;;  %87 = vadd.xlane.f32.xlu1 %v82_v24 }
  0xc3   :  { %p660_p5 = por %p659_p4, %p658_p3 }
  0xc5   :  { %p661_p6 = pnand %p660_p5, %p654_p2 }
  0xc6   :  { %91 = vadd.xlane.f32.xlu1 %v84_v25 }
 0x14b   :  { %v86_v47 = vpop.xlane.xlu0 %85 }
 0x14c   :  { %v93_v48 = vmul.f32 0.0078125, %v86_v47 }
 0x14e   :  { %v97_v49 = vadd.f32 1e-05, %v93_v48 }
 0x14f   :  { %v88_v50 = vpop.xlane.xlu1 %87  ;;  %v90_v51 = vpop.xlane.xlu0 %89 }
 0x150   :  { %601 = vrsqrt.f32 %v97_v49  ;;  %v94_v52 = vmul.f32 0.0078125, %v88_v50  ;;  %v95_v53 = vmul.f32 0.0078125, %v90_v51 }
 0x152   :  { %v98_v54 = vadd.f32 1e-05, %v94_v52  ;;  %v99_v55 = vadd.f32 1e-05, %v95_v53 }
 0x153   :  { %v92_v56 = vpop.xlane.xlu1 %91 }
 0x154   :  { %603 = vrsqrt.f32 %v98_v54  ;;  %v96_v57 = vmul.f32 0.0078125, %v92_v56 }
 0x155   :  { %605 = vrsqrt.f32 %v99_v55 }
 0x156   :  { %v100_v58 = vadd.f32 1e-05, %v96_v57 }
 0x158   :  { %607 = vrsqrt.f32 %v100_v58 }
 0x15a   :  { %v602_v59 = vpop.eup %601 }
 0x15b   :  { %v105_v60 = vmul.f32 %v602_v59, %v746_v14 }
 0x15d   :  { %v115_v1 = vmul.f32 %v480_v61, %v105_v60 }
 0x15e   :  { %v604_v62 = vpop.eup %603 }
 0x15f   :  { %v606_v63 = vpop.eup %605  ;;  %v106_v0 = vmul.f32 %v604_v62, %v752_v21  ;;  %v125_v6 = vadd.f32 %v481_v2, %v115_v1  ;;  %v179_v21 = vsub.s32 2, %v170_v17 }
 0x160   :  { %v107_v3 = vmul.f32 %v606_v63, %v748_v15  ;;  %v171_v15 = vsub.s32 0, %v170_v17 }
 0x161   :  { %v116_v4 = vmul.f32 %v480_v61, %v106_v0  ;;  %v180_v26 = vrot.slane %v167_v18, %v179_v21 }
 0x162   :  { %v608_v5 = vpop.eup %607  ;;  %v117_v9 = vmul.f32 %v480_v61, %v107_v3  ;;  %v172_v20 = vrot.slane %v167_v18, %v171_v15 }
 0x163   :  { %v126_v7 = vadd.f32 %v481_v2, %v116_v4  ;;  %v108_v8 = vmul.f32 %v608_v5, %v754_v22  ;;  %v176_v22 = vrot.slane %v167_v18, %v175_v19 }
 0x164   :  { %v127_v12 = vadd.f32 %v481_v2, %v117_v9 }
 0x165   :  { %v129_v10 = vpack.c.bf16 %v126_v7, %v125_v6  ;;  %v118_v11 = vmul.f32 %v480_v61, %v108_v8 }
 0x167   :  { %345 = vmatmul.mubr.bf16.vlgmr.msra.gmra.mrb[0].mxu0 %v129_v10  ;;  %557 = vmatprep.mubr.bf16.mxu1 %v129_v10  ;;  %v128_v13 = vadd.f32 %v481_v2, %v118_v11 }
 0x168   :  { %354 = vmatprep.mubr.bf16.mxu0 %v687_v41 }
 0x169   :  { %v130_v14 = vpack.c.bf16 %v128_v13, %v127_v12 }
 0x16b   :  { %558 = vmatmul.mubr.bf16.vlgmr.msra.gmra.mrb[0].mxu1 %v130_v14 }
 0x16f   :  { %355 = vmatmul.mubr.bf16.gmra.mrb[4].mxu0 %v130_v14 }
 0x23a   :  { %v346_v23 = vpop.f32.mrb[0].mxu0 }
 0x23b   :  { %v347_v24 = vadd.f32 %v346_v23, %v172_v20  ;;  %v348_v25 = vpop.f32.mrb[1].mxu0 }
 0x23c   :  { %v349_v27 = vadd.f32 %v348_v25, %v176_v22  ;;  %v350_v28 = vpop.f32.mrb[2].mxu0 }
 0x23d   :  { %v351_v29 = vadd.f32 %v350_v28, %v172_v20  ;;  %v352_v30 = vpop.f32.mrb[3].mxu0 }
 0x23e   :  { %v514_v31 = vpack.c.bf16 %v349_v27, %v347_v24  ;;  %v353_v32 = vadd.f32 %v352_v30, %v176_v22  ;;  %v559_v33 = vpop.f32.mrb[0].mxu1 }
 0x23f   :  { %v408_v34 = vadd.f32 %v559_v33, %v180_v26  ;;  %v399_v35 = vpop.f32.mrb[1].mxu1 }
 0x240   :  { %454 = vst [vmem:[#allocation8] sm:$0xff] %v514_v31  ;;  %v516_v36 = vpack.c.bf16 %v353_v32, %v351_v29  ;;  %v400_v37 = vadd.f32 %v399_v35, %v180_v26  ;;  %v560_v38 = vpop.f32.mrb[2].mxu1 }
 0x241   :  { %v519_v39 = vpack.c.bf16 %v408_v34, %v408_v34  ;;  %v411_v40 = vadd.f32 %v560_v38, %v180_v26  ;;  %v402_v41 = vpop.f32.mrb[3].mxu1 }
 0x242   :  { %456 = vst [vmem:[#allocation8 + $0xc] sm:$0xff] %v516_v36  ;;  %v515_v42 = vpack.c.bf16 %v400_v37, %v400_v37  ;;  %v403_v43 = vadd.f32 %v402_v41, %v180_v26  ;;  %v356_v44 = vpop.f32.mrb[4].mxu0 }
 0x243   :  { %459 = vst [vmem:[#allocation8 + $0x20] sm:$0xf] %v519_v39  ;;  %v521_v45 = vpack.c.bf16 %v411_v40, %v411_v40  ;;  %v357_v46 = vadd.f32 %v356_v44, %v172_v20  ;;  %v358_v47 = vpop.f32.mrb[5].mxu0 }
 0x244   :  { %455 = vst [vmem:[#allocation8 + $0x8] sm:$0xf] %v515_v42  ;;  %v517_v48 = vpack.c.bf16 %v403_v43, %v403_v43  ;;  %v359_v49 = vadd.f32 %v358_v47, %v176_v22  ;;  %v360_v50 = vpop.f32.mrb[6].mxu0 }
 0x245   :  { %461 = vst [vmem:[#allocation8 + $0x2c] sm:$0xf] %v521_v45  ;;  %v361_v51 = vadd.f32 %v360_v50, %v172_v20  ;;  %v362_v52 = vpop.f32.mrb[7].mxu0 }
 0x246   :  { %457 = vst [vmem:[#allocation8 + $0x14] sm:$0xf] %v517_v48  ;;  %v518_v53 = vpack.c.bf16 %v359_v49, %v357_v46  ;;  %v363_v54 = vadd.f32 %v362_v52, %v176_v22 }
 0x248   :  { %458 = vst [vmem:[#allocation8 + $0x18] sm:$0xff] %v518_v53  ;;  %v520_v55 = vpack.c.bf16 %v363_v54, %v361_v51 }
 0x24a   :  { %460 = vst [vmem:[#allocation8 + $0x24] sm:$0xff] %v520_v55 }
 0x24b   :  { %664 = shalt.err (!%p661_p6)
}
 0x24c   :  { %s665_s27 = scalar_lea.hbm %s795_s5, 768 }
 0x24d   :  { %p666_p7 = scmp.ne.s32.totalorder %s795_s5, %s665_s27  ;;  %p669_p8 = scmp.lt.u32.totalorder %s665_s27, %s795_s5 }
 0x24f   :  { %p671_p9 = pnand %p669_p8, %p666_p7 }
 0x251   :  { %674 = shalt.err (!%p671_p9)
}
 0x252   :  { %473 = dma.vmem_to_hbm [thread:$0]  %s468_s23, 768, %s795_s5, [#allocation5], %s685_s0, %s685_s0, %s686_s17  }
 0x253   :  { %679 = dma.done.wait [#allocation5], 768  }
 0x254   :  { %680 = vsyncadd [#allocation5], 4294966528 }
 0x255   :  { %477 = vsyncpa [#allocation4], 1 }
 0x256   :  { %478 = vsyncpa [#allocation7], 1 }
 0x257   :  { %479 = vsyncpa [#allocation5], 1 }

</bundles_post_ra>
